<compile_context>
chip_gen: v5e
topology: v5e:2x2
jax: 0.10.0
libtpu: 0.0.40
codegen_flags: <defaults>
</compile_context>

<pallas_src>
import jax
import jax.numpy as jnp
from jax.experimental import pallas as pl
from jax.experimental.pallas import tpu as pltpu

BN_EPS = 1e-5


def _residual_kernel(xcol_ref, w3_ref, w1_ref,
                     g1_ref, b1_ref, g2_ref, b2_ref, out_ref):
    """Fused Residual forward, pixels-on-lanes layout. All refs VMEM resident.

    xcol_ref : (9C, N)  im2col of the zero-padded input (raw, pre-ReLU),
                        tap-major rows; tap 4 (kh=1,kw=1) is the raw x.
    w3_ref   : (C, 9C)  3x3 conv weight, laid out so h1 = w3T @ relu(xcol)
    w1_ref   : (C, C)   1x1 conv weight (transposed: rows = out channels)
    g*/b*    : (C, 1)   BatchNorm affine params
    out_ref  : (C, N)
    """
    c, n_pix = out_ref.shape
    inv_n = 1.0 / float(n_pix)

    xcol = xcol_ref[...]                                    # (9C, N) raw

    # ---- ReLU -> Conv3x3 as one (C,9C)@(9C,N) MXU matmul --------------------
    h0 = jnp.maximum(xcol, 0.0)                             # relu(0)=0 on pads
    h1 = jnp.dot(w3_ref[...], h0, preferred_element_type=jnp.float32)  # (C,N)

    # ---- BN1 (training-mode batch stats over pixels = lane axis) + ReLU -----
    mu1 = jnp.sum(h1, axis=1, keepdims=True) * inv_n        # (C,1)
    d1 = h1 - mu1
    var1 = jnp.sum(d1 * d1, axis=1, keepdims=True) * inv_n
    scale1 = jax.lax.rsqrt(var1 + BN_EPS) * g1_ref[...]     # EUP rsqrt
    shift1 = b1_ref[...] - mu1 * scale1
    h1 = jnp.maximum(h1 * scale1 + shift1, 0.0)             # fused scale/shift

    # ---- Conv1x1 (plain matmul) ---------------------------------------------
    h2 = jnp.dot(w1_ref[...], h1, preferred_element_type=jnp.float32)  # (C,N)

    # ---- BN2 + residual add (center tap of im2col == raw x) ------------------
    mu2 = jnp.sum(h2, axis=1, keepdims=True) * inv_n
    d2 = h2 - mu2
    var2 = jnp.sum(d2 * d2, axis=1, keepdims=True) * inv_n
    scale2 = jax.lax.rsqrt(var2 + BN_EPS) * g2_ref[...]
    shift2 = b2_ref[...] - mu2 * scale2

    x_center = xcol[4 * c:5 * c, :]                         # (C, N) raw input
    out_ref[...] = x_center + (h2 * scale2 + shift2)


def residual_forward(x_nchw, params):
    """x_nchw: (B, C, H, W) -> (B, C, H, W), matching the PyTorch module."""
    x = x_nchw.astype(jnp.float32)
    b, c, h, w = x.shape
    n_pix = b * h * w

    # Layout plumbing only: zero-pad spatially and stack the 9 taps so the
    # kernel sees a lane-dense (9C, B*H*W) slab (pixels on lanes, tap-major
    # channel rows).  No NHWC round-trip is needed in this layout.
    xpad = jnp.pad(x, ((0, 0), (0, 0), (1, 1), (1, 1)))
    taps = jnp.stack([xpad[:, :, kh:kh + h, kw:kw + w]
                      for kh in range(3) for kw in range(3)], axis=0)
    xcolT = jnp.transpose(taps, (0, 2, 1, 3, 4)).reshape(9 * c, n_pix)
    # TODO(synk): for non-toy shapes, build this slab inside the kernel from a
    # DMA'd padded-input tile instead of materializing 9x the bytes in HBM.

    # (KH, KW, Cin, Cout) -> (Cout, KH*KW*Cin), matching xcolT row order.
    w3T = jnp.transpose(params["w3"], (3, 0, 1, 2)).reshape(c, 9 * c)
    w1T = params["w1"].T                                    # (Cout, Cin)

    vmem = pl.BlockSpec(memory_space=pltpu.MemorySpace.VMEM)
    args = (xcolT, w3T, w1T,
            params["g1"].reshape(c, 1), params["beta1"].reshape(c, 1),
            params["g2"].reshape(c, 1), params["beta2"].reshape(c, 1))

    outT = pl.pallas_call(
        _residual_kernel,
        out_shape=jax.ShapeDtypeStruct((c, n_pix), jnp.float32),
        in_specs=[vmem] * len(args),
        out_specs=vmem,
    )(*args)
    # TODO(synk): at scale, tile the pixel axis with a grid + two-pass BN
    # (stats pass, then normalize/conv/residual), mark it "parallel" for v7x's
    # 2 TensorCores, and cast matmul operands to bf16 on v6e/v7x.

    return jnp.transpose(outT.reshape(c, b, h, w), (1, 0, 2, 3))


def init_params(key, channels):
    """PyTorch-Conv2d-style uniform init; random BN affine for a stronger check."""
    k3, k1, kg1, kb1, kg2, kb2 = jax.random.split(key, 6)
    bound3 = 1.0 / jnp.sqrt(jnp.float32(channels * 9))
    bound1 = 1.0 / jnp.sqrt(jnp.float32(channels))
    return {
        # (KH, KW, Cin, Cout) (HWIO) — matches both the reference conv and the
        # tap-major im2col row ordering after the wrapper transpose/reshape.
        "w3": jax.random.uniform(k3, (3, 3, channels, channels), jnp.float32,
                                 -bound3, bound3),
        "w1": jax.random.uniform(k1, (channels, channels), jnp.float32,
                                 -bound1, bound1),
        "g1": jax.random.uniform(kg1, (channels,), jnp.float32, 0.5, 1.5),
        "beta1": 0.1 * jax.random.normal(kb1, (channels,), jnp.float32),
        "g2": jax.random.uniform(kg2, (channels,), jnp.float32, 0.5, 1.5),
        "beta2": 0.1 * jax.random.normal(kb2, (channels,), jnp.float32),
    }


def _reference_forward(x_nchw, p):
    """Pure-JAX reference (XLA conv + two-pass BN) for validation."""
    x = x_nchw.astype(jnp.float32)
    h = jnp.maximum(x, 0.0)
    h = jnp.transpose(h, (0, 2, 3, 1))                      # NHWC
    h = jax.lax.conv_general_dilated(
        h, p["w3"], window_strides=(1, 1), padding="SAME",
        dimension_numbers=("NHWC", "HWIO", "NHWC"))

    def bn(t, g, beta):
        mu = jnp.mean(t, axis=(0, 1, 2), keepdims=True)
        var = jnp.mean((t - mu) ** 2, axis=(0, 1, 2), keepdims=True)
        return (t - mu) / jnp.sqrt(var + BN_EPS) * g.reshape(1, 1, 1, -1) \
            + beta.reshape(1, 1, 1, -1)

    h = jnp.maximum(bn(h, p["g1"], p["beta1"]), 0.0)
    h = jnp.einsum("bhwc,cd->bhwd", h, p["w1"])
    h = bn(h, p["g2"], p["beta2"])
    return x + jnp.transpose(h, (0, 3, 1, 2))


if __name__ == "__main__":
    key = jax.random.PRNGKey(0)
    k_params, k_x = jax.random.split(key)

    CHANNELS = 4
    params = init_params(k_params, CHANNELS)
    x = jax.random.normal(k_x, (2, CHANNELS, 16, 16), jnp.float32)

    out = jax.block_until_ready(residual_forward(x, params))

    ref = _reference_forward(x, params)
    assert out.shape == x.shape
    assert jnp.allclose(out, ref, atol=1e-4, rtol=1e-4), \
        f"max abs diff {jnp.max(jnp.abs(out - ref))}"

    print("KERNEL_OK")
</pallas_src>

<mosaic_0001>
module attributes {stable_mosaic.version = 11 : i64} {
  func.func @_residual_kernel(%arg0: memref<36x512xf32, #tpu.memory_space<vmem>>, %arg1: memref<4x36xf32, #tpu.memory_space<vmem>>, %arg2: memref<4x4xf32, #tpu.memory_space<vmem>>, %arg3: memref<4x1xf32, #tpu.memory_space<vmem>>, %arg4: memref<4x1xf32, #tpu.memory_space<vmem>>, %arg5: memref<4x1xf32, #tpu.memory_space<vmem>>, %arg6: memref<4x1xf32, #tpu.memory_space<vmem>>, %arg7: memref<4x512xf32, #tpu.memory_space<vmem>>) attributes {dimension_semantics = [], scalar_prefetch = 0 : i64, scratch_operands = 0 : i64, tpu.core_type = #tpu.core_type<tc>} {
    %c0 = arith.constant 0 : index
    %c0_0 = arith.constant 0 : index
    %0 = vector.load %arg0[%c0, %c0_0] : memref<36x512xf32, #tpu.memory_space<vmem>>, vector<36x512xf32>
    %cst = arith.constant 0.000000e+00 : f32
    %1 = vector.broadcast %cst : f32 to vector<36x512xf32>
    %2 = arith.maximumf %0, %1 : vector<36x512xf32>
    %c0_1 = arith.constant 0 : index
    %c0_2 = arith.constant 0 : index
    %3 = vector.load %arg1[%c0_1, %c0_2] : memref<4x36xf32, #tpu.memory_space<vmem>>, vector<4x36xf32>
    %cst_3 = arith.constant dense<0.000000e+00> : vector<4x512xf32>
    %4 = tpu.matmul %3, %2, %cst_3 {dimension_numbers = #tpu.dot_dimension_numbers<[1], [0], [0], [1], [0, 0, 1, 1], [], []>} : vector<4x36xf32>, vector<36x512xf32>, vector<4x512xf32> -> vector<4x512xf32>
    %cst_4 = arith.constant dense<0.000000e+00> : vector<4xf32>
    %5 = vector.multi_reduction <add>, %4, %cst_4 [1] : vector<4x512xf32> to vector<4xf32>
    %6 = vector.shape_cast %5 : vector<4xf32> to vector<4x1xf32>
    %cst_5 = arith.constant 0.001953125 : f32
    %7 = vector.broadcast %cst_5 : f32 to vector<4x1xf32>
    %8 = arith.mulf %6, %7 : vector<4x1xf32>
    %9 = vector.broadcast %8 : vector<4x1xf32> to vector<4x512xf32>
    %10 = arith.subf %4, %9 : vector<4x512xf32>
    %11 = arith.mulf %10, %10 : vector<4x512xf32>
    %cst_6 = arith.constant dense<0.000000e+00> : vector<4xf32>
    %12 = vector.multi_reduction <add>, %11, %cst_6 [1] : vector<4x512xf32> to vector<4xf32>
    %13 = vector.shape_cast %12 : vector<4xf32> to vector<4x1xf32>
    %cst_7 = arith.constant 0.001953125 : f32
    %14 = vector.broadcast %cst_7 : f32 to vector<4x1xf32>
    %15 = arith.mulf %13, %14 : vector<4x1xf32>
    %cst_8 = arith.constant 9.99999974E-6 : f32
    %16 = vector.broadcast %cst_8 : f32 to vector<4x1xf32>
    %17 = arith.addf %15, %16 : vector<4x1xf32>
    %18 = math.rsqrt %17 : vector<4x1xf32>
    %c0_9 = arith.constant 0 : index
    %c0_10 = arith.constant 0 : index
    %19 = vector.load %arg3[%c0_9, %c0_10] : memref<4x1xf32, #tpu.memory_space<vmem>>, vector<4x1xf32>
    %20 = arith.mulf %18, %19 : vector<4x1xf32>
    %c0_11 = arith.constant 0 : index
    %c0_12 = arith.constant 0 : index
    %21 = vector.load %arg4[%c0_11, %c0_12] : memref<4x1xf32, #tpu.memory_space<vmem>>, vector<4x1xf32>
    %22 = arith.mulf %8, %20 : vector<4x1xf32>
    %23 = arith.subf %21, %22 : vector<4x1xf32>
    %24 = vector.broadcast %20 : vector<4x1xf32> to vector<4x512xf32>
    %25 = arith.mulf %4, %24 : vector<4x512xf32>
    %26 = vector.broadcast %23 : vector<4x1xf32> to vector<4x512xf32>
    %27 = arith.addf %25, %26 : vector<4x512xf32>
    %cst_13 = arith.constant 0.000000e+00 : f32
    %28 = vector.broadcast %cst_13 : f32 to vector<4x512xf32>
    %29 = arith.maximumf %27, %28 : vector<4x512xf32>
    %c0_14 = arith.constant 0 : index
    %c0_15 = arith.constant 0 : index
    %30 = vector.load %arg2[%c0_14, %c0_15] : memref<4x4xf32, #tpu.memory_space<vmem>>, vector<4x4xf32>
    %cst_16 = arith.constant dense<0.000000e+00> : vector<4x512xf32>
    %31 = tpu.matmul %30, %29, %cst_16 {dimension_numbers = #tpu.dot_dimension_numbers<[1], [0], [0], [1], [0, 0, 1, 1], [], []>} : vector<4x4xf32>, vector<4x512xf32>, vector<4x512xf32> -> vector<4x512xf32>
    %cst_17 = arith.constant dense<0.000000e+00> : vector<4xf32>
    %32 = vector.multi_reduction <add>, %31, %cst_17 [1] : vector<4x512xf32> to vector<4xf32>
    %33 = vector.shape_cast %32 : vector<4xf32> to vector<4x1xf32>
    %cst_18 = arith.constant 0.001953125 : f32
    %34 = vector.broadcast %cst_18 : f32 to vector<4x1xf32>
    %35 = arith.mulf %33, %34 : vector<4x1xf32>
    %36 = vector.broadcast %35 : vector<4x1xf32> to vector<4x512xf32>
    %37 = arith.subf %31, %36 : vector<4x512xf32>
    %38 = arith.mulf %37, %37 : vector<4x512xf32>
    %cst_19 = arith.constant dense<0.000000e+00> : vector<4xf32>
    %39 = vector.multi_reduction <add>, %38, %cst_19 [1] : vector<4x512xf32> to vector<4xf32>
    %40 = vector.shape_cast %39 : vector<4xf32> to vector<4x1xf32>
    %cst_20 = arith.constant 0.001953125 : f32
    %41 = vector.broadcast %cst_20 : f32 to vector<4x1xf32>
    %42 = arith.mulf %40, %41 : vector<4x1xf32>
    %cst_21 = arith.constant 9.99999974E-6 : f32
    %43 = vector.broadcast %cst_21 : f32 to vector<4x1xf32>
    %44 = arith.addf %42, %43 : vector<4x1xf32>
    %45 = math.rsqrt %44 : vector<4x1xf32>
    %c0_22 = arith.constant 0 : index
    %c0_23 = arith.constant 0 : index
    %46 = vector.load %arg5[%c0_22, %c0_23] : memref<4x1xf32, #tpu.memory_space<vmem>>, vector<4x1xf32>
    %47 = arith.mulf %45, %46 : vector<4x1xf32>
    %c0_24 = arith.constant 0 : index
    %c0_25 = arith.constant 0 : index
    %48 = vector.load %arg6[%c0_24, %c0_25] : memref<4x1xf32, #tpu.memory_space<vmem>>, vector<4x1xf32>
    %49 = arith.mulf %35, %47 : vector<4x1xf32>
    %50 = arith.subf %48, %49 : vector<4x1xf32>
    %51 = vector.extract_strided_slice %0 {offsets = [16, 0], sizes = [4, 512], strides = [1, 1]} : vector<36x512xf32> to vector<4x512xf32>
    %52 = vector.broadcast %47 : vector<4x1xf32> to vector<4x512xf32>
    %53 = arith.mulf %31, %52 : vector<4x512xf32>
    %54 = vector.broadcast %50 : vector<4x1xf32> to vector<4x512xf32>
    %55 = arith.addf %53, %54 : vector<4x512xf32>
    %56 = arith.addf %51, %55 : vector<4x512xf32>
    %c0_26 = arith.constant 0 : index
    %c0_27 = arith.constant 0 : index
    %57 = vector.load %arg7[%c0_26, %c0_27] : memref<4x512xf32, #tpu.memory_space<vmem>>, vector<4x512xf32>
    tpu.vector_store %arg7[%c0_26, %c0_27], %56 {strides = array<i32>} : memref<4x512xf32, #tpu.memory_space<vmem>>, vector<4x512xf32>,
    return
  }
}

</mosaic_0001>

<bundles_post_ra>
// kernel: tpu_custom_call.1
= control target key start
LH: loop header
LB: loop body
LE: loop exit
PB: predicated region body
PF: predicated region fallthrough
CT: control target
= control target key end

     0   :  { %12 = vsyncpa [#allocation3], 0  ;;  %s629_s0 = inlined_call_operand.hbm [shape: f32[36,512], index: 0, kind: input, shape index: {}]   ;;  %s630_s1 = inlined_call_operand.vmem [shape: f32[4,36], index: 1, kind: input, shape index: {}]   ;;  %s631_s2 = inlined_call_operand.vmem [shape: f32[4,4], index: 2, kind: input, shape index: {}]   ;;  %s632_s3 = inlined_call_operand.vmem [shape: f32[4,1], index: 3, kind: input, shape index: {}]   ;;  %s633_s4 = inlined_call_operand.vmem [shape: f32[4,1], index: 4, kind: input, shape index: {}]   ;;  %s634_s5 = inlined_call_operand.vmem [shape: f32[4,1], index: 5, kind: input, shape index: {}]   ;;  %s635_s6 = inlined_call_operand.vmem [shape: f32[4,1], index: 6, kind: input, shape index: {}]   ;;  %s636_s7 = inlined_call_operand.hbm [shape: f32[4,512], index: 7, kind: output, shape index: {}]  }
   0x1   :  { %13 = vsyncpa [#allocation4], 0  ;;  %s18_s26 = sshll.u32 %s629_s0, 4  ;;  %s518_s27 = smov [#allocation2]   ;;  %s19_s26 = int_to_ptr.hbm [resolvable:$true] %s18_s26 }
   0x2   :  { %s20_s28 = sshll.u32 %s518_s27, 4  ;;  %s519_s29 = smov 512   ;;  %s21_s28 = int_to_ptr.vmem [resolvable:$true] %s20_s28 }
   0x3   :  { %s520_s30 = smov 32  }
   0x4   :  { %26 = dma.hbm_to_vmem [thread:$0]  %s19_s26, 2560, %s21_s28, [#allocation3], %s519_s29, %s519_s29, %s520_s30  }
   0x5   :  { %514 = dma.done.wait [#allocation3], 2560  }
   0x6   :  { %515 = vsyncadd [#allocation3], 4294964736  ;;  %v61_v0 = vld [vmem:[#allocation2 + $0x90] sm:$0xf]  ;;  %vm88_vm0 = vcmask 1043456   ;;  %v58_v11 = vld [vmem:[#allocation2 + $0x78] sm:$0xff] }
   0x7   :  { %v57_v1 = vld [vmem:[#allocation2 + $0x70] sm:$0xff]  ;;  %v62_v2 = vld [vmem:[#allocation2 + $0x98] sm:$0xf]  ;;  %v81_v3 = vmax.f32 %v61_v0, 0.0  ;;  %v59_v6 = vld [vmem:[#allocation2 + $0x80] sm:$0xf] }
   0x8   :  { %v77_v4 = vmax.f32 %v57_v1, 0.0  ;;  %v82_v5 = vmax.f32 %v62_v2, 0.0  ;;  %v566_v7 = vld [vmem:[#allocation2 + $0x50] sm:$0xff]  ;;  %v79_v8 = vmax.f32 %v59_v6, 0.0  ;;  %v60_v9 = vld [vmem:[#allocation2 + $0x88] sm:$0xf] }
   0x9   :  { %v73_v10 = vmax.f32 %v566_v7, 0.0  ;;  %v55_v12 = vld [vmem:[#allocation2 + $0x60] sm:$0xff]  ;;  %443 = vmatpush.msk.msra.mxu2 %vm88_vm0, %v81_v3  ;;  %v80_v13 = vmax.f32 %v60_v9, 0.0  ;;  %v78_v14 = vmax.f32 %v58_v11, 0.0  ;;  %v56_v16 = vld [vmem:[#allocation2 + $0x68] sm:$0xff]  ;;  %v49_v17 = vld [vmem:[#allocation2 + $0x30] sm:$0xff] }
   0xa   :  { %445 = vmatpush.msk.msra.mxu3 %vm88_vm0, %v82_v5  ;;  %v75_v15 = vmax.f32 %v55_v12, 0.0  ;;  %v571_v18 = vld [vmem:[#allocation2 + $0x58] sm:$0xff]  ;;  %439 = vmatpush.msk.msra.mxu0 %vm88_vm0, %v79_v8  ;;  %v76_v19 = vmax.f32 %v56_v16, 0.0  ;;  %v575_v21 = vld [vmem:[#allocation2 + $0x40] sm:$0xff]  ;;  %v577_v22 = vld [vmem:[#allocation2 + $0x48] sm:$0xff]  ;;  %v69_v24 = vmax.f32 %v49_v17, 0.0 }
   0xb   :  { %v74_v20 = vmax.f32 %v571_v18, 0.0  ;;  %v45_v23 = vld [vmem:[#allocation2 + $0x10] sm:$0xff]  ;;  %153 = vmatpush.msra.mxu2 %v77_v4  ;;  %441 = vmatpush.msk.msra.mxu1 %vm88_vm0, %v80_v13  ;;  %v71_v25 = vmax.f32 %v575_v21, 0.0  ;;  %v72_v26 = vmax.f32 %v577_v22, 0.0  ;;  %v50_v27 = vld [vmem:[#allocation2 + $0x38] sm:$0xff]  ;;  %v47_v29 = vld [vmem:[#allocation2 + $0x20] sm:$0xff] }
   0xc   :  { %173 = vmatpush.msra.mxu3 %v78_v14  ;;  %113 = vmatpush.msra.mxu0 %v75_v15  ;;  %v70_v28 = vmax.f32 %v50_v27, 0.0  ;;  %v48_v30 = vld [vmem:[#allocation2 + $0x28] sm:$0xff]  ;;  %v46_v31 = vld [vmem:[#allocation2 + $0x18] sm:$0xff]  ;;  %v65_v32 = vmax.f32 %v45_v23, 0.0  ;;  %v67_v33 = vmax.f32 %v47_v29, 0.0  ;;  %v43_v35 = vld [vmem:[#allocation2] sm:$0xff] }
   0xd   :  { %154 = vmatpush.msra.mxu2 %v73_v10  ;;  %133 = vmatpush.msra.mxu1 %v76_v19  ;;  %v68_v34 = vmax.f32 %v48_v30, 0.0  ;;  %v44_v36 = vld [vmem:[#allocation2 + $0x8] sm:$0xff]  ;;  %v66_v37 = vmax.f32 %v46_v31, 0.0  ;;  %v83_v38 = vld [vmem:[%s630_s1] sm:$0xf]  ;;  %vm84_vm1 = vcmask 293888  }
   0xe   :  { %174 = vmatpush.msra.mxu3 %v74_v20  ;;  %114 = vmatpush.msra.mxu0 %v71_v25  ;;  %v63_v39 = vmax.f32 %v43_v35, 0.0  ;;  %v64_v40 = vmax.f32 %v44_v36, 0.0  ;;  %v521_v5 = vmov 0   ;;  %v220_v16 = vld [vmem:[%s632_s3] sm:$0xf]  ;;  %vm248_vm5 = vcmask 31744  }
   0xf   :  { %155 = vmatpush.msra.mxu2 %v69_v24  ;;  %134 = vmatpush.msra.mxu1 %v72_v26  ;;  %v222_v23 = vld [vmem:[%s633_s4] sm:$0xf]  ;;  %s429_s17 = sshll.u32 %s636_s7, 4  ;;  %s430_s17 = int_to_ptr.hbm [resolvable:$true] %s429_s17 }
  0x10   :  { %175 = vmatpush.msra.mxu3 %v70_v28  ;;  %115 = vmatpush.msra.mxu0 %v67_v33 }
  0x11   :  { %156 = vmatpush.msra.mxu2 %v65_v32  ;;  %135 = vmatpush.msra.mxu1 %v68_v34 }
  0x12   :  { %444 = vmatmul.msk.f32.vlgmr.msra.gmra.mxu2 %vm84_vm1, %v83_v38  ;;  %176 = vmatpush.msra.mxu3 %v66_v37 }
  0x13   :  { %446 = vmatmul.msk.f32.vlgmr.msra.gmra.mxu3 %vm84_vm1, %v83_v38  ;;  %116 = vmatpush.msra.mxu0 %v63_v39  ;;  %v247_v39 = vld [vmem:[%s631_s2] sm:$0xf] }
  0x14   :  { %136 = vmatpush.msra.mxu1 %v64_v40  ;;  %440 = vmatmul.msk.f32.vlgmr.msra.gmra.mxu0 %vm84_vm1, %v83_v38 }
  0x15   :  { %442 = vmatmul.msk.f32.vlgmr.msra.gmra.mxu1 %vm84_vm1, %v83_v38  ;;  %460 = vset.pattern.permute.xlu1 %v521_v5 }
  0x16   :  { %461 = vset.pattern.permute.xlu0 %v521_v5 }
  0x91   :  { %v118_v41 = vpop.f32.mrf.mxu0 }
  0x92   :  { %v181_v42 = vsel %vm88_vm0, %v118_v41, 0.0  ;;  %v138_v43 = vpop.f32.mrf.mxu1 }
  0x93   :  { %v182_v44 = vsel %vm88_vm0, %v138_v43, 0.0 }
  0x94   :  { %v183_v45 = vadd.f32 %v182_v44, %v181_v42 }
  0x95   :  { %v158_v46 = vpop.f32.mrf.mxu2 }
  0x96   :  { %v178_v47 = vpop.f32.mrf.mxu3  ;;  %v184_v48 = vsel %vm88_vm0, %v158_v46, 0.0 }
  0x97   :  { %v185_v49 = vadd.f32 %v184_v48, %v183_v45  ;;  %v186_v50 = vsel %vm88_vm0, %v178_v47, 0.0 }
  0x99   :  { %v187_v51 = vadd.f32 %v186_v50, %v185_v49 }
  0x9b   :  { %188 = vadd.xlane.f32.xlu0 %v187_v51 }
 0x10e   :  { %v189_v52 = vpop.xlane.xlu0 %188 }
 0x10f   :  { %v190_v53 = vmul.f32 0.001953125, %v189_v52 }
 0x111   :  { %v191_v54 = vsub.f32 %v118_v41, %v190_v53  ;;  %v192_v55 = vsub.f32 %v138_v43, %v190_v53  ;;  %v193_v56 = vsub.f32 %v158_v46, %v190_v53  ;;  %v194_v57 = vsub.f32 %v178_v47, %v190_v53 }
 0x113   :  { %v195_v58 = vmul.f32 %v191_v54, %v191_v54  ;;  %v196_v59 = vmul.f32 %v192_v55, %v192_v55  ;;  %v197_v60 = vmul.f32 %v193_v56, %v193_v56  ;;  %v198_v61 = vmul.f32 %v194_v57, %v194_v57 }
 0x115   :  { %v199_v62 = vsel %vm88_vm0, %v195_v58, 0.0  ;;  %v200_v63 = vsel %vm88_vm0, %v196_v59, 0.0  ;;  %v202_v1 = vsel %vm88_vm0, %v197_v60, 0.0  ;;  %v204_v3 = vsel %vm88_vm0, %v198_v61, 0.0 }
 0x116   :  { %v201_v0 = vadd.f32 %v200_v63, %v199_v62 }
 0x118   :  { %v203_v2 = vadd.f32 %v202_v1, %v201_v0 }
 0x11a   :  { %v205_v4 = vadd.f32 %v204_v3, %v203_v2 }
 0x11c   :  { %206 = vadd.xlane.f32.xlu0 %v205_v4 }
 0x18f   :  { %v207_v6 = vpop.xlane.xlu0 %206 }
 0x190   :  { %v208_v8 = vmul.f32 0.001953125, %v207_v6 }
 0x192   :  { %v209_v9 = vadd.f32 1e-05, %v208_v8 }
 0x194   :  { %462 = vrsqrt.f32 %v209_v9  ;;  %vm216_vm3 = vweird.f32 %v209_v9 }
 0x19a   :  { %v463_v10 = vpop.eup %462 }
 0x19b   :  { %v211_v11 = vmul.f32 %v463_v10, %v209_v9  ;;  %vm217_vm2 = vweird.f32 %v463_v10 }
 0x19c   :  { %vm218_vm4 = vmor %vm216_vm3, %vm217_vm2 }
 0x19d   :  { %v212_v12 = vmul.f32 %v463_v10, %v211_v11 }
 0x19f   :  { %v213_v13 = vmul.f32 0.5, %v212_v12 }
 0x1a1   :  { %v214_v14 = vsub.f32 1.5, %v213_v13 }
 0x1a3   :  { %v215_v15 = vmul.f32 %v463_v10, %v214_v14  ;;  %v383_v14 = vld [vmem:[%s634_s5] sm:$0xf]  ;;  %s522_s5 = smov [#allocation5]  }
 0x1a5   :  { %v219_v17 = vsel %vm218_vm4, %v463_v10, %v215_v15 }
 0x1a6   :  { %v221_v19 = vmul.f32 %v220_v16, %v219_v17  ;;  %v385_v17 = vld [vmem:[%s635_s6] sm:$0xf]  ;;  %s427_s6 = sshll.u32 %s522_s5, 4  ;;  %s428_s6 = int_to_ptr.vmem [resolvable:$true] %s427_s6 }
 0x1a8   :  { %227 = vperm.xlu1 %460, %v221_v19   ;;  %v223_v20 = vmul.f32 %v221_v19, %v190_v53 }
 0x1aa   :  { %v224_v24 = vsub.f32 %v222_v23, %v223_v20 }
 0x1b0   :  { %236 = vperm.xlu1 %460, %v224_v24  }
 0x21a   :  { %v228_v25 = vpop.permute.xlu1 %227 }
 0x21b   :  { %v230_v26 = vmul.f32 %v228_v25, %v118_v41  ;;  %v231_v27 = vmul.f32 %v228_v25, %v138_v43  ;;  %v232_v28 = vmul.f32 %v228_v25, %v158_v46  ;;  %v233_v29 = vmul.f32 %v228_v25, %v178_v47 }
 0x222   :  { %v237_v30 = vpop.permute.xlu1 %236 }
 0x223   :  { %v239_v31 = vadd.f32 %v237_v30, %v230_v26  ;;  %v240_v32 = vadd.f32 %v237_v30, %v231_v27  ;;  %v241_v33 = vadd.f32 %v237_v30, %v232_v28  ;;  %v242_v34 = vadd.f32 %v237_v30, %v233_v29 }
 0x225   :  { %v243_v35 = vmax.f32 %v239_v31, 0.0  ;;  %v244_v36 = vmax.f32 %v240_v32, 0.0  ;;  %v245_v37 = vmax.f32 %v241_v33, 0.0  ;;  %v246_v38 = vmax.f32 %v242_v34, 0.0 }
 0x227   :  { %447 = vmatpush.msk.msrb.mxu0 %vm88_vm0, %v243_v35  ;;  %449 = vmatpush.msk.msrb.mxu1 %vm88_vm0, %v244_v36 }
 0x228   :  { %451 = vmatpush.msk.msrb.mxu2 %vm88_vm0, %v245_v37  ;;  %453 = vmatpush.msk.msrb.mxu3 %vm88_vm0, %v246_v38 }
 0x229   :  { %452 = vmatmul.msk.f32.vlgmr.msrb.gmra.mxu2 %vm248_vm5, %v247_v39  ;;  %454 = vmatmul.msk.f32.vlgmr.msrb.gmra.mxu3 %vm248_vm5, %v247_v39 }
 0x22a   :  { %448 = vmatmul.msk.f32.vlgmr.msrb.gmra.mxu0 %vm248_vm5, %v247_v39  ;;  %450 = vmatmul.msk.f32.vlgmr.msrb.gmra.mxu1 %vm248_vm5, %v247_v39 }
 0x2a7   :  { %v281_v40 = vpop.f32.mrf.mxu0  ;;  %v301_v41 = vpop.f32.mrf.mxu1 }
 0x2a8   :  { %v344_v42 = vsel %vm88_vm0, %v281_v40, 0.0  ;;  %v345_v43 = vsel %vm88_vm0, %v301_v41, 0.0 }
 0x2a9   :  { %v346_v44 = vadd.f32 %v345_v43, %v344_v42 }
 0x2ac   :  { %v321_v45 = vpop.f32.mrf.mxu2  ;;  %v341_v46 = vpop.f32.mrf.mxu3 }
 0x2ad   :  { %v347_v47 = vsel %vm88_vm0, %v321_v45, 0.0  ;;  %v349_v48 = vsel %vm88_vm0, %v341_v46, 0.0 }
 0x2ae   :  { %v348_v49 = vadd.f32 %v347_v47, %v346_v44 }
 0x2b0   :  { %v350_v50 = vadd.f32 %v349_v48, %v348_v49 }
 0x2b2   :  { %351 = vadd.xlane.f32.xlu2 %v350_v50 }
 0x325   :  { %v352_v51 = vpop.xlane.xlu2 %351 }
 0x326   :  { %v353_v52 = vmul.f32 0.001953125, %v352_v51 }
 0x328   :  { %v354_v53 = vsub.f32 %v281_v40, %v353_v52  ;;  %v355_v54 = vsub.f32 %v301_v41, %v353_v52  ;;  %v356_v55 = vsub.f32 %v321_v45, %v353_v52  ;;  %v357_v56 = vsub.f32 %v341_v46, %v353_v52 }
 0x32a   :  { %v358_v57 = vmul.f32 %v354_v53, %v354_v53  ;;  %v359_v58 = vmul.f32 %v355_v54, %v355_v54  ;;  %v360_v59 = vmul.f32 %v356_v55, %v356_v55  ;;  %v361_v60 = vmul.f32 %v357_v56, %v357_v56 }
 0x32c   :  { %v362_v61 = vsel %vm88_vm0, %v358_v57, 0.0  ;;  %v363_v62 = vsel %vm88_vm0, %v359_v58, 0.0  ;;  %v365_v0 = vsel %vm88_vm0, %v360_v59, 0.0  ;;  %v367_v2 = vsel %vm88_vm0, %v361_v60, 0.0 }
 0x32d   :  { %v364_v63 = vadd.f32 %v363_v62, %v362_v61 }
 0x32f   :  { %v366_v1 = vadd.f32 %v365_v0, %v364_v63 }
 0x331   :  { %v368_v3 = vadd.f32 %v367_v2, %v366_v1 }
 0x333   :  { %369 = vadd.xlane.f32.xlu2 %v368_v3 }
 0x3a6   :  { %v370_v4 = vpop.xlane.xlu2 %369 }
 0x3a7   :  { %v371_v5 = vmul.f32 0.001953125, %v370_v4 }
 0x3a9   :  { %v372_v6 = vadd.f32 1e-05, %v371_v5 }
 0x3ab   :  { %464 = vrsqrt.f32 %v372_v6  ;;  %vm379_vm7 = vweird.f32 %v372_v6 }
 0x3b1   :  { %v465_v8 = vpop.eup %464 }
 0x3b2   :  { %v374_v9 = vmul.f32 %v465_v8, %v372_v6  ;;  %vm380_vm6 = vweird.f32 %v465_v8 }
 0x3b3   :  { %vm381_vm8 = vmor %vm379_vm7, %vm380_vm6 }
 0x3b4   :  { %v375_v10 = vmul.f32 %v465_v8, %v374_v9 }
 0x3b6   :  { %v376_v11 = vmul.f32 0.5, %v375_v10 }
 0x3b8   :  { %v377_v12 = vsub.f32 1.5, %v376_v11 }
 0x3ba   :  { %v378_v13 = vmul.f32 %v465_v8, %v377_v12 }
 0x3bc   :  { %v382_v15 = vsel %vm381_vm8, %v465_v8, %v378_v13 }
 0x3bd   :  { %v384_v16 = vmul.f32 %v383_v14, %v382_v15 }
 0x3bf   :  { %390 = vperm.xlu0 %461, %v384_v16   ;;  %v386_v19 = vmul.f32 %v384_v16, %v353_v52 }
 0x3c1   :  { %v387_v20 = vsub.f32 %v385_v17, %v386_v19 }
 0x3c3   :  { %399 = vperm.xlu1 %460, %v387_v20  }
 0x431   :  { %v391_v23 = vpop.permute.xlu0 %390 }
 0x432   :  { %v393_v24 = vmul.f32 %v391_v23, %v281_v40  ;;  %v394_v25 = vmul.f32 %v391_v23, %v301_v41  ;;  %v395_v26 = vmul.f32 %v391_v23, %v321_v45  ;;  %v396_v27 = vmul.f32 %v391_v23, %v341_v46 }
 0x435   :  { %v400_v28 = vpop.permute.xlu1 %399 }
 0x436   :  { %v402_v29 = vadd.f32 %v400_v28, %v393_v24  ;;  %v403_v30 = vadd.f32 %v400_v28, %v394_v25  ;;  %v404_v31 = vadd.f32 %v400_v28, %v395_v26  ;;  %v405_v32 = vadd.f32 %v400_v28, %v396_v27 }
 0x438   :  { %v407_v33 = vadd.f32 %v403_v30, %v577_v22  ;;  %v409_v34 = vadd.f32 %v405_v32, %v571_v18  ;;  %v406_v35 = vadd.f32 %v402_v29, %v575_v21  ;;  %v408_v36 = vadd.f32 %v404_v31, %v566_v7 }
 0x43a   :  { %v414_v37 = vrot.slane %v407_v33, 4  ;;  %v415_v38 = vrot.slane %v409_v34, 4 }
 0x43c   :  { %v416_v39 = vsel %vm88_vm0, %v406_v35, %v414_v37  ;;  %v417_v40 = vsel %vm88_vm0, %v408_v36, %v415_v38 }
 0x43d   :  { %420 = vst [vmem:[#allocation5] sm:$0xff] %v416_v39 }
 0x43e   :  { %421 = vst [vmem:[#allocation5 + $0x8] sm:$0xff] %v417_v40 }
 0x43f   :  { %432 = dma.vmem_to_hbm [thread:$0]  %s428_s6, 256, %s430_s17, [#allocation4]  }
 0x440   :  { %516 = dma.done.wait [#allocation4], 256  }
 0x441   :  { %517 = vsyncadd [#allocation4], 4294967040 }
 0x442   :  { %437 = vsyncpa [#allocation3], 1 }
 0x443   :  { %438 = vsyncpa [#allocation4], 1 }

</bundles_post_ra>
